<compile_context>
chip_gen: v7x
topology: tpu7x:2x2x1
jax: 0.10.0
libtpu: 0.0.40
codegen_flags: <defaults>
</compile_context>

<pallas_src>
import jax
import jax.numpy as jnp
from jax.experimental import pallas as pl
from jax.experimental.pallas import tpu as pltpu


def decoder_rnn_kernel(x_ref, h0_ref, c0_ref, wih_ref, whh_ref, b_ref,
                       wout_ref, bout_ref, out_ref, hn_ref, cn_ref,
                       hstack_ref):
    SB, _ = x_ref.shape                      # (S*B, I)
    B, H = h0_ref.shape
    S = SB // B

    # ---- Pre-loop: input projection for ALL timesteps, one bf16 MXU matmul.
    # xproj = x @ W_ih^T + (b_ih + b_hh)   -> (S*B, 4H), f32 accumulation.
    xproj = jnp.dot(x_ref[...].astype(jnp.bfloat16), wih_ref[...],
                    preferred_element_type=jnp.float32) + b_ref[...]

    w_hh = whh_ref[...]                      # (H, 4H) f32 recurrent weights

    h = h0_ref[...]                          # (B, H) f32
    c = c0_ref[...]                          # (B, H) f32

    # ---- Recurrence: only the true serial h/c dependency chain remains.
    for t in range(S):
        # gates = xproj[t] + h @ W_hh^T     -> (B, 4H) f32
        gates = xproj[t * B:(t + 1) * B, :] + jnp.dot(
            h, w_hh, preferred_element_type=jnp.float32)

        # Two full-vreg EUP passes (sigmoid + tanh), then lane-slice.
        sig = jax.nn.sigmoid(gates)
        tnh = jnp.tanh(gates)

        i_g = sig[:, 0 * H:1 * H]            # PyTorch gate order: i, f, g, o
        f_g = sig[:, 1 * H:2 * H]
        g_g = tnh[:, 2 * H:3 * H]
        o_g = sig[:, 3 * H:4 * H]

        c = f_g * c + i_g * g_g
        h = o_g * jnp.tanh(c)

        # Stash h_t for the deferred head; not on the h/c dependency chain.
        hstack_ref[t * B:(t + 1) * B, :] = h

    hn_ref[...] = h
    cn_ref[...] = c

    # ---- Post-loop: one head matmul + bias + single output store.
    out_ref[...] = jnp.dot(hstack_ref[...].astype(jnp.bfloat16), wout_ref[...],
                           preferred_element_type=jnp.float32) + bout_ref[...]


def decoder_rnn_forward(x, h0, c0, params):
    """x: (S, B, I); h0, c0: (1, B, H). Returns (outputs, (h_n, c_n))."""
    S, B, I = x.shape
    H = h0.shape[-1]
    O = params["b_out"].shape[-1]

    out2d, h_n, c_n = pl.pallas_call(
        decoder_rnn_kernel,
        out_shape=(
            jax.ShapeDtypeStruct((S * B, O), jnp.float32),
            jax.ShapeDtypeStruct((B, H), jnp.float32),
            jax.ShapeDtypeStruct((B, H), jnp.float32),
        ),
        scratch_shapes=[pltpu.VMEM((S * B, H), jnp.float32)],
    )(
        x.reshape(S * B, I),       # free XLA reshape; kernel stays 2-D
        h0[0], c0[0],
        params["w_ih_t"],          # (I, 4H) bf16
        params["w_hh_t"],          # (H, 4H) f32
        params["b"],               # (1, 4H) f32  (= b_ih + b_hh)
        params["w_out_t"],         # (H, O)  bf16
        params["b_out"],           # (1, O)  f32
    )

    return out2d.reshape(S, B, O), (h_n[None], c_n[None])


def reference_forward(x, h0, c0, raw, proj_dtype):
    """Pure-JAX reference (PyTorch nn.LSTM + nn.Linear semantics).

    proj_dtype=bf16 mirrors the kernel's math exactly (tight check);
    proj_dtype=f32 gives full-precision module semantics (loose check).
    The recurrent matmul is f32 in both, exactly like the kernel.
    """
    S, B, I = x.shape
    H = h0.shape[-1]
    w_ih_t = raw["w_ih"].T.astype(proj_dtype)        # (I, 4H)
    w_hh_t = raw["w_hh"].T                           # (H, 4H) f32
    w_out_t = raw["w_out"].T.astype(proj_dtype)      # (H, O)
    b = (raw["b_ih"] + raw["b_hh"])[None, :]
    b_out = raw["b_out"][None, :]

    xproj = jnp.dot(x.reshape(S * B, I).astype(proj_dtype), w_ih_t,
                    preferred_element_type=jnp.float32) + b
    xproj = xproj.reshape(S, B, 4 * H)

    def step(carry, xp_t):
        h, c = carry
        gates = xp_t + jnp.dot(h, w_hh_t, preferred_element_type=jnp.float32)
        i = jax.nn.sigmoid(gates[:, 0 * H:1 * H])
        f = jax.nn.sigmoid(gates[:, 1 * H:2 * H])
        g = jnp.tanh(gates[:, 2 * H:3 * H])
        o = jax.nn.sigmoid(gates[:, 3 * H:4 * H])
        c_new = f * c + i * g
        h_new = o * jnp.tanh(c_new)
        return (h_new, c_new), h_new

    (h_n, c_n), hs = jax.lax.scan(step, (h0[0], c0[0]), xproj)
    outs = (jnp.dot(hs.reshape(S * B, H).astype(proj_dtype), w_out_t,
                    preferred_element_type=jnp.float32) + b_out
            ).reshape(S, B, -1)
    return outs, (h_n[None], c_n[None])


if __name__ == "__main__":
    # Small shapes consistent with the module's forward:
    S, B = 8, 8                       # seq length, batch
    input_size, hidden_size, output_size = 16, 32, 16

    key = jax.random.PRNGKey(0)
    ks = jax.random.split(key, 9)

    # Deterministic synthetic parameters in PyTorch layouts.
    w_ih = jax.random.normal(ks[0], (4 * hidden_size, input_size), jnp.float32) * 0.1
    w_hh = jax.random.normal(ks[1], (4 * hidden_size, hidden_size), jnp.float32) * 0.1
    b_ih = jax.random.normal(ks[2], (4 * hidden_size,), jnp.float32) * 0.1
    b_hh = jax.random.normal(ks[3], (4 * hidden_size,), jnp.float32) * 0.1
    w_out = jax.random.normal(ks[4], (output_size, hidden_size), jnp.float32) * 0.1
    b_out = jax.random.normal(ks[5], (output_size,), jnp.float32) * 0.1

    raw = {"w_ih": w_ih, "w_hh": w_hh, "b_ih": b_ih, "b_hh": b_hh,
           "w_out": w_out, "b_out": b_out}

    # Kernel params: bf16 input-projection / head weights (MXU), f32 recurrent
    # weights and biases.
    params = {
        "w_ih_t": w_ih.T.astype(jnp.bfloat16),       # (I, 4H)
        "w_hh_t": w_hh.T,                            # (H, 4H) f32
        "b": (b_ih + b_hh)[None, :],                 # (1, 4H)
        "w_out_t": w_out.T.astype(jnp.bfloat16),     # (H, O)
        "b_out": b_out[None, :],                     # (1, O)
    }

    x = jax.random.normal(ks[6], (S, B, input_size), jnp.float32)
    h0 = jax.random.normal(ks[7], (1, B, hidden_size), jnp.float32)
    c0 = jax.random.normal(ks[8], (1, B, hidden_size), jnp.float32)

    outputs, (h_n, c_n) = decoder_rnn_forward(x, h0, c0, params)
    jax.block_until_ready((outputs, h_n, c_n))

    # Tight check vs. a reference mirroring the kernel's bf16/f32 math.
    ref_out, (ref_h, ref_c) = reference_forward(x, h0, c0, raw, jnp.bfloat16)
    assert jnp.allclose(outputs, ref_out, atol=1e-3, rtol=1e-3)
    assert jnp.allclose(h_n, ref_h, atol=1e-3, rtol=1e-3)
    assert jnp.allclose(c_n, ref_c, atol=1e-3, rtol=1e-3)

    # Looser check vs. full-f32 module semantics (bf16 weight quantization only
    # on the input projection and head; the recurrence itself is f32).
    f32_out, (f32_h, f32_c) = reference_forward(x, h0, c0, raw, jnp.float32)
    assert jnp.allclose(outputs, f32_out, atol=3e-2, rtol=3e-2)
    assert jnp.allclose(h_n, f32_h, atol=3e-2, rtol=3e-2)
    assert jnp.allclose(c_n, f32_c, atol=3e-2, rtol=3e-2)

    print("KERNEL_OK")
</pallas_src>

<mosaic_0001>
module attributes {stable_mosaic.version = 11 : i64} {
  func.func @decoder_rnn_kernel(%arg0: memref<64x16xf32, #tpu.memory_space<vmem>>, %arg1: memref<8x32xf32, #tpu.memory_space<vmem>>, %arg2: memref<8x32xf32, #tpu.memory_space<vmem>>, %arg3: memref<16x128xbf16, #tpu.memory_space<vmem>>, %arg4: memref<32x128xf32, #tpu.memory_space<vmem>>, %arg5: memref<1x128xf32, #tpu.memory_space<vmem>>, %arg6: memref<32x16xbf16, #tpu.memory_space<vmem>>, %arg7: memref<1x16xf32, #tpu.memory_space<vmem>>, %arg8: memref<64x16xf32, #tpu.memory_space<vmem>>, %arg9: memref<8x32xf32, #tpu.memory_space<vmem>>, %arg10: memref<8x32xf32, #tpu.memory_space<vmem>>, %arg11: memref<64x32xf32, #tpu.memory_space<vmem>>) attributes {dimension_semantics = [], scalar_prefetch = 0 : i64, scratch_operands = 1 : i64, tpu.core_type = #tpu.core_type<tc>} {
    %c0 = arith.constant 0 : index
    %c0_0 = arith.constant 0 : index
    %0 = vector.load %arg0[%c0, %c0_0] : memref<64x16xf32, #tpu.memory_space<vmem>>, vector<64x16xf32>
    %1 = arith.truncf %0 : vector<64x16xf32> to vector<64x16xbf16>
    %c0_1 = arith.constant 0 : index
    %c0_2 = arith.constant 0 : index
    %2 = vector.load %arg3[%c0_1, %c0_2] : memref<16x128xbf16, #tpu.memory_space<vmem>>, vector<16x128xbf16>
    %cst = arith.constant dense<0.000000e+00> : vector<64x128xf32>
    %3 = tpu.matmul %1, %2, %cst {dimension_numbers = #tpu.dot_dimension_numbers<[1], [0], [0], [1], [0, 0, 1, 1], [], []>} : vector<64x16xbf16>, vector<16x128xbf16>, vector<64x128xf32> -> vector<64x128xf32>
    %c0_3 = arith.constant 0 : index
    %c0_4 = arith.constant 0 : index
    %4 = vector.load %arg5[%c0_3, %c0_4] : memref<1x128xf32, #tpu.memory_space<vmem>>, vector<1x128xf32>
    %5 = vector.broadcast %4 : vector<1x128xf32> to vector<64x128xf32>
    %6 = arith.addf %3, %5 : vector<64x128xf32>
    %c0_5 = arith.constant 0 : index
    %c0_6 = arith.constant 0 : index
    %7 = vector.load %arg4[%c0_5, %c0_6] : memref<32x128xf32, #tpu.memory_space<vmem>>, vector<32x128xf32>
    %c0_7 = arith.constant 0 : index
    %c0_8 = arith.constant 0 : index
    %8 = vector.load %arg1[%c0_7, %c0_8] : memref<8x32xf32, #tpu.memory_space<vmem>>, vector<8x32xf32>
    %c0_9 = arith.constant 0 : index
    %c0_10 = arith.constant 0 : index
    %9 = vector.load %arg2[%c0_9, %c0_10] : memref<8x32xf32, #tpu.memory_space<vmem>>, vector<8x32xf32>
    %10 = vector.extract_strided_slice %6 {offsets = [0, 0], sizes = [8, 128], strides = [1, 1]} : vector<64x128xf32> to vector<8x128xf32>
    %cst_11 = arith.constant dense<0.000000e+00> : vector<8x128xf32>
    %11 = tpu.matmul %8, %7, %cst_11 {dimension_numbers = #tpu.dot_dimension_numbers<[1], [0], [0], [1], [0, 0, 1, 1], [], []>} : vector<8x32xf32>, vector<32x128xf32>, vector<8x128xf32> -> vector<8x128xf32>
    %12 = arith.addf %10, %11 : vector<8x128xf32>
    %13 = arith.negf %12 : vector<8x128xf32>
    %14 = math.exp %13 : vector<8x128xf32>
    %cst_12 = arith.constant 1.000000e+00 : f32
    %15 = vector.broadcast %cst_12 : f32 to vector<8x128xf32>
    %16 = arith.addf %15, %14 : vector<8x128xf32>
    %17 = arith.divf %15, %16 : vector<8x128xf32>
    %18 = math.tanh %12 : vector<8x128xf32>
    %19 = vector.extract_strided_slice %17 {offsets = [0, 0], sizes = [8, 32], strides = [1, 1]} : vector<8x128xf32> to vector<8x32xf32>
    %20 = vector.extract_strided_slice %17 {offsets = [0, 32], sizes = [8, 32], strides = [1, 1]} : vector<8x128xf32> to vector<8x32xf32>
    %21 = vector.extract_strided_slice %18 {offsets = [0, 64], sizes = [8, 32], strides = [1, 1]} : vector<8x128xf32> to vector<8x32xf32>
    %22 = vector.extract_strided_slice %17 {offsets = [0, 96], sizes = [8, 32], strides = [1, 1]} : vector<8x128xf32> to vector<8x32xf32>
    %23 = arith.mulf %20, %9 : vector<8x32xf32>
    %24 = arith.mulf %19, %21 : vector<8x32xf32>
    %25 = arith.addf %23, %24 : vector<8x32xf32>
    %26 = math.tanh %25 : vector<8x32xf32>
    %27 = arith.mulf %22, %26 : vector<8x32xf32>
    %c0_13 = arith.constant 0 : index
    %c0_14 = arith.constant 0 : index
    %28 = vector.load %arg11[%c0_13, %c0_14] : memref<64x32xf32, #tpu.memory_space<vmem>>, vector<8x32xf32>
    tpu.vector_store %arg11[%c0_13, %c0_14], %27 {strides = array<i32>} : memref<64x32xf32, #tpu.memory_space<vmem>>, vector<8x32xf32>,
    %29 = vector.extract_strided_slice %6 {offsets = [8, 0], sizes = [8, 128], strides = [1, 1]} : vector<64x128xf32> to vector<8x128xf32>
    %cst_15 = arith.constant dense<0.000000e+00> : vector<8x128xf32>
    %30 = tpu.matmul %27, %7, %cst_15 {dimension_numbers = #tpu.dot_dimension_numbers<[1], [0], [0], [1], [0, 0, 1, 1], [], []>} : vector<8x32xf32>, vector<32x128xf32>, vector<8x128xf32> -> vector<8x128xf32>
    %31 = arith.addf %29, %30 : vector<8x128xf32>
    %32 = arith.negf %31 : vector<8x128xf32>
    %33 = math.exp %32 : vector<8x128xf32>
    %cst_16 = arith.constant 1.000000e+00 : f32
    %34 = vector.broadcast %cst_16 : f32 to vector<8x128xf32>
    %35 = arith.addf %34, %33 : vector<8x128xf32>
    %36 = arith.divf %34, %35 : vector<8x128xf32>
    %37 = math.tanh %31 : vector<8x128xf32>
    %38 = vector.extract_strided_slice %36 {offsets = [0, 0], sizes = [8, 32], strides = [1, 1]} : vector<8x128xf32> to vector<8x32xf32>
    %39 = vector.extract_strided_slice %36 {offsets = [0, 32], sizes = [8, 32], strides = [1, 1]} : vector<8x128xf32> to vector<8x32xf32>
    %40 = vector.extract_strided_slice %37 {offsets = [0, 64], sizes = [8, 32], strides = [1, 1]} : vector<8x128xf32> to vector<8x32xf32>
    %41 = vector.extract_strided_slice %36 {offsets = [0, 96], sizes = [8, 32], strides = [1, 1]} : vector<8x128xf32> to vector<8x32xf32>
    %42 = arith.mulf %39, %25 : vector<8x32xf32>
    %43 = arith.mulf %38, %40 : vector<8x32xf32>
    %44 = arith.addf %42, %43 : vector<8x32xf32>
    %45 = math.tanh %44 : vector<8x32xf32>
    %46 = arith.mulf %41, %45 : vector<8x32xf32>
    %c8 = arith.constant 8 : index
    %c0_17 = arith.constant 0 : index
    %47 = vector.load %arg11[%c8, %c0_17] : memref<64x32xf32, #tpu.memory_space<vmem>>, vector<8x32xf32>
    tpu.vector_store %arg11[%c8, %c0_17], %46 {strides = array<i32>} : memref<64x32xf32, #tpu.memory_space<vmem>>, vector<8x32xf32>,
    %48 = vector.extract_strided_slice %6 {offsets = [16, 0], sizes = [8, 128], strides = [1, 1]} : vector<64x128xf32> to vector<8x128xf32>
    %cst_18 = arith.constant dense<0.000000e+00> : vector<8x128xf32>
    %49 = tpu.matmul %46, %7, %cst_18 {dimension_numbers = #tpu.dot_dimension_numbers<[1], [0], [0], [1], [0, 0, 1, 1], [], []>} : vector<8x32xf32>, vector<32x128xf32>, vector<8x128xf32> -> vector<8x128xf32>
    %50 = arith.addf %48, %49 : vector<8x128xf32>
    %51 = arith.negf %50 : vector<8x128xf32>
    %52 = math.exp %51 : vector<8x128xf32>
    %cst_19 = arith.constant 1.000000e+00 : f32
    %53 = vector.broadcast %cst_19 : f32 to vector<8x128xf32>
    %54 = arith.addf %53, %52 : vector<8x128xf32>
    %55 = arith.divf %53, %54 : vector<8x128xf32>
    %56 = math.tanh %50 : vector<8x128xf32>
    %57 = vector.extract_strided_slice %55 {offsets = [0, 0], sizes = [8, 32], strides = [1, 1]} : vector<8x128xf32> to vector<8x32xf32>
    %58 = vector.extract_strided_slice %55 {offsets = [0, 32], sizes = [8, 32], strides = [1, 1]} : vector<8x128xf32> to vector<8x32xf32>
    %59 = vector.extract_strided_slice %56 {offsets = [0, 64], sizes = [8, 32], strides = [1, 1]} : vector<8x128xf32> to vector<8x32xf32>
    %60 = vector.extract_strided_slice %55 {offsets = [0, 96], sizes = [8, 32], strides = [1, 1]} : vector<8x128xf32> to vector<8x32xf32>
    %61 = arith.mulf %58, %44 : vector<8x32xf32>
    %62 = arith.mulf %57, %59 : vector<8x32xf32>
    %63 = arith.addf %61, %62 : vector<8x32xf32>
    %64 = math.tanh %63 : vector<8x32xf32>
    %65 = arith.mulf %60, %64 : vector<8x32xf32>
    %c16 = arith.constant 16 : index
    %c0_20 = arith.constant 0 : index
    %66 = vector.load %arg11[%c16, %c0_20] : memref<64x32xf32, #tpu.memory_space<vmem>>, vector<8x32xf32>
    tpu.vector_store %arg11[%c16, %c0_20], %65 {strides = array<i32>} : memref<64x32xf32, #tpu.memory_space<vmem>>, vector<8x32xf32>,
    %67 = vector.extract_strided_slice %6 {offsets = [24, 0], sizes = [8, 128], strides = [1, 1]} : vector<64x128xf32> to vector<8x128xf32>
    %cst_21 = arith.constant dense<0.000000e+00> : vector<8x128xf32>
    %68 = tpu.matmul %65, %7, %cst_21 {dimension_numbers = #tpu.dot_dimension_numbers<[1], [0], [0], [1], [0, 0, 1, 1], [], []>} : vector<8x32xf32>, vector<32x128xf32>, vector<8x128xf32> -> vector<8x128xf32>
    %69 = arith.addf %67, %68 : vector<8x128xf32>
    %70 = arith.negf %69 : vector<8x128xf32>
    %71 = math.exp %70 : vector<8x128xf32>
    %cst_22 = arith.constant 1.000000e+00 : f32
    %72 = vector.broadcast %cst_22 : f32 to vector<8x128xf32>
    %73 = arith.addf %72, %71 : vector<8x128xf32>
    %74 = arith.divf %72, %73 : vector<8x128xf32>
    %75 = math.tanh %69 : vector<8x128xf32>
    %76 = vector.extract_strided_slice %74 {offsets = [0, 0], sizes = [8, 32], strides = [1, 1]} : vector<8x128xf32> to vector<8x32xf32>
    %77 = vector.extract_strided_slice %74 {offsets = [0, 32], sizes = [8, 32], strides = [1, 1]} : vector<8x128xf32> to vector<8x32xf32>
    %78 = vector.extract_strided_slice %75 {offsets = [0, 64], sizes = [8, 32], strides = [1, 1]} : vector<8x128xf32> to vector<8x32xf32>
    %79 = vector.extract_strided_slice %74 {offsets = [0, 96], sizes = [8, 32], strides = [1, 1]} : vector<8x128xf32> to vector<8x32xf32>
    %80 = arith.mulf %77, %63 : vector<8x32xf32>
    %81 = arith.mulf %76, %78 : vector<8x32xf32>
    %82 = arith.addf %80, %81 : vector<8x32xf32>
    %83 = math.tanh %82 : vector<8x32xf32>
    %84 = arith.mulf %79, %83 : vector<8x32xf32>
    %c24 = arith.constant 24 : index
    %c0_23 = arith.constant 0 : index
    %85 = vector.load %arg11[%c24, %c0_23] : memref<64x32xf32, #tpu.memory_space<vmem>>, vector<8x32xf32>
    tpu.vector_store %arg11[%c24, %c0_23], %84 {strides = array<i32>} : memref<64x32xf32, #tpu.memory_space<vmem>>, vector<8x32xf32>,
    %86 = vector.extract_strided_slice %6 {offsets = [32, 0], sizes = [8, 128], strides = [1, 1]} : vector<64x128xf32> to vector<8x128xf32>
    %cst_24 = arith.constant dense<0.000000e+00> : vector<8x128xf32>
    %87 = tpu.matmul %84, %7, %cst_24 {dimension_numbers = #tpu.dot_dimension_numbers<[1], [0], [0], [1], [0, 0, 1, 1], [], []>} : vector<8x32xf32>, vector<32x128xf32>, vector<8x128xf32> -> vector<8x128xf32>
    %88 = arith.addf %86, %87 : vector<8x128xf32>
    %89 = arith.negf %88 : vector<8x128xf32>
    %90 = math.exp %89 : vector<8x128xf32>
    %cst_25 = arith.constant 1.000000e+00 : f32
    %91 = vector.broadcast %cst_25 : f32 to vector<8x128xf32>
    %92 = arith.addf %91, %90 : vector<8x128xf32>
    %93 = arith.divf %91, %92 : vector<8x128xf32>
    %94 = math.tanh %88 : vector<8x128xf32>
    %95 = vector.extract_strided_slice %93 {offsets = [0, 0], sizes = [8, 32], strides = [1, 1]} : vector<8x128xf32> to vector<8x32xf32>
    %96 = vector.extract_strided_slice %93 {offsets = [0, 32], sizes = [8, 32], strides = [1, 1]} : vector<8x128xf32> to vector<8x32xf32>
    %97 = vector.extract_strided_slice %94 {offsets = [0, 64], sizes = [8, 32], strides = [1, 1]} : vector<8x128xf32> to vector<8x32xf32>
    %98 = vector.extract_strided_slice %93 {offsets = [0, 96], sizes = [8, 32], strides = [1, 1]} : vector<8x128xf32> to vector<8x32xf32>
    %99 = arith.mulf %96, %82 : vector<8x32xf32>
    %100 = arith.mulf %95, %97 : vector<8x32xf32>
    %101 = arith.addf %99, %100 : vector<8x32xf32>
    %102 = math.tanh %101 : vector<8x32xf32>
    %103 = arith.mulf %98, %102 : vector<8x32xf32>
    %c32 = arith.constant 32 : index
    %c0_26 = arith.constant 0 : index
    %104 = vector.load %arg11[%c32, %c0_26] : memref<64x32xf32, #tpu.memory_space<vmem>>, vector<8x32xf32>
    tpu.vector_store %arg11[%c32, %c0_26], %103 {strides = array<i32>} : memref<64x32xf32, #tpu.memory_space<vmem>>, vector<8x32xf32>,
    %105 = vector.extract_strided_slice %6 {offsets = [40, 0], sizes = [8, 128], strides = [1, 1]} : vector<64x128xf32> to vector<8x128xf32>
    %cst_27 = arith.constant dense<0.000000e+00> : vector<8x128xf32>
    %106 = tpu.matmul %103, %7, %cst_27 {dimension_numbers = #tpu.dot_dimension_numbers<[1], [0], [0], [1], [0, 0, 1, 1], [], []>} : vector<8x32xf32>, vector<32x128xf32>, vector<8x128xf32> -> vector<8x128xf32>
    %107 = arith.addf %105, %106 : vector<8x128xf32>
    %108 = arith.negf %107 : vector<8x128xf32>
    %109 = math.exp %108 : vector<8x128xf32>
    %cst_28 = arith.constant 1.000000e+00 : f32
    %110 = vector.broadcast %cst_28 : f32 to vector<8x128xf32>
    %111 = arith.addf %110, %109 : vector<8x128xf32>
    %112 = arith.divf %110, %111 : vector<8x128xf32>
    %113 = math.tanh %107 : vector<8x128xf32>
    %114 = vector.extract_strided_slice %112 {offsets = [0, 0], sizes = [8, 32], strides = [1, 1]} : vector<8x128xf32> to vector<8x32xf32>
    %115 = vector.extract_strided_slice %112 {offsets = [0, 32], sizes = [8, 32], strides = [1, 1]} : vector<8x128xf32> to vector<8x32xf32>
    %116 = vector.extract_strided_slice %113 {offsets = [0, 64], sizes = [8, 32], strides = [1, 1]} : vector<8x128xf32> to vector<8x32xf32>
    %117 = vector.extract_strided_slice %112 {offsets = [0, 96], sizes = [8, 32], strides = [1, 1]} : vector<8x128xf32> to vector<8x32xf32>
    %118 = arith.mulf %115, %101 : vector<8x32xf32>
    %119 = arith.mulf %114, %116 : vector<8x32xf32>
    %120 = arith.addf %118, %119 : vector<8x32xf32>
    %121 = math.tanh %120 : vector<8x32xf32>
    %122 = arith.mulf %117, %121 : vector<8x32xf32>
    %c40 = arith.constant 40 : index
    %c0_29 = arith.constant 0 : index
    %123 = vector.load %arg11[%c40, %c0_29] : memref<64x32xf32, #tpu.memory_space<vmem>>, vector<8x32xf32>
    tpu.vector_store %arg11[%c40, %c0_29], %122 {strides = array<i32>} : memref<64x32xf32, #tpu.memory_space<vmem>>, vector<8x32xf32>,
    %124 = vector.extract_strided_slice %6 {offsets = [48, 0], sizes = [8, 128], strides = [1, 1]} : vector<64x128xf32> to vector<8x128xf32>
    %cst_30 = arith.constant dense<0.000000e+00> : vector<8x128xf32>
    %125 = tpu.matmul %122, %7, %cst_30 {dimension_numbers = #tpu.dot_dimension_numbers<[1], [0], [0], [1], [0, 0, 1, 1], [], []>} : vector<8x32xf32>, vector<32x128xf32>, vector<8x128xf32> -> vector<8x128xf32>
    %126 = arith.addf %124, %125 : vector<8x128xf32>
    %127 = arith.negf %126 : vector<8x128xf32>
    %128 = math.exp %127 : vector<8x128xf32>
    %cst_31 = arith.constant 1.000000e+00 : f32
    %129 = vector.broadcast %cst_31 : f32 to vector<8x128xf32>
    %130 = arith.addf %129, %128 : vector<8x128xf32>
    %131 = arith.divf %129, %130 : vector<8x128xf32>
    %132 = math.tanh %126 : vector<8x128xf32>
    %133 = vector.extract_strided_slice %131 {offsets = [0, 0], sizes = [8, 32], strides = [1, 1]} : vector<8x128xf32> to vector<8x32xf32>
    %134 = vector.extract_strided_slice %131 {offsets = [0, 32], sizes = [8, 32], strides = [1, 1]} : vector<8x128xf32> to vector<8x32xf32>
    %135 = vector.extract_strided_slice %132 {offsets = [0, 64], sizes = [8, 32], strides = [1, 1]} : vector<8x128xf32> to vector<8x32xf32>
    %136 = vector.extract_strided_slice %131 {offsets = [0, 96], sizes = [8, 32], strides = [1, 1]} : vector<8x128xf32> to vector<8x32xf32>
    %137 = arith.mulf %134, %120 : vector<8x32xf32>
    %138 = arith.mulf %133, %135 : vector<8x32xf32>
    %139 = arith.addf %137, %138 : vector<8x32xf32>
    %140 = math.tanh %139 : vector<8x32xf32>
    %141 = arith.mulf %136, %140 : vector<8x32xf32>
    %c48 = arith.constant 48 : index
    %c0_32 = arith.constant 0 : index
    %142 = vector.load %arg11[%c48, %c0_32] : memref<64x32xf32, #tpu.memory_space<vmem>>, vector<8x32xf32>
    tpu.vector_store %arg11[%c48, %c0_32], %141 {strides = array<i32>} : memref<64x32xf32, #tpu.memory_space<vmem>>, vector<8x32xf32>,
    %143 = vector.extract_strided_slice %6 {offsets = [56, 0], sizes = [8, 128], strides = [1, 1]} : vector<64x128xf32> to vector<8x128xf32>
    %cst_33 = arith.constant dense<0.000000e+00> : vector<8x128xf32>
    %144 = tpu.matmul %141, %7, %cst_33 {dimension_numbers = #tpu.dot_dimension_numbers<[1], [0], [0], [1], [0, 0, 1, 1], [], []>} : vector<8x32xf32>, vector<32x128xf32>, vector<8x128xf32> -> vector<8x128xf32>
    %145 = arith.addf %143, %144 : vector<8x128xf32>
    %146 = arith.negf %145 : vector<8x128xf32>
    %147 = math.exp %146 : vector<8x128xf32>
    %cst_34 = arith.constant 1.000000e+00 : f32
    %148 = vector.broadcast %cst_34 : f32 to vector<8x128xf32>
    %149 = arith.addf %148, %147 : vector<8x128xf32>
    %150 = arith.divf %148, %149 : vector<8x128xf32>
    %151 = math.tanh %145 : vector<8x128xf32>
    %152 = vector.extract_strided_slice %150 {offsets = [0, 0], sizes = [8, 32], strides = [1, 1]} : vector<8x128xf32> to vector<8x32xf32>
    %153 = vector.extract_strided_slice %150 {offsets = [0, 32], sizes = [8, 32], strides = [1, 1]} : vector<8x128xf32> to vector<8x32xf32>
    %154 = vector.extract_strided_slice %151 {offsets = [0, 64], sizes = [8, 32], strides = [1, 1]} : vector<8x128xf32> to vector<8x32xf32>
    %155 = vector.extract_strided_slice %150 {offsets = [0, 96], sizes = [8, 32], strides = [1, 1]} : vector<8x128xf32> to vector<8x32xf32>
    %156 = arith.mulf %153, %139 : vector<8x32xf32>
    %157 = arith.mulf %152, %154 : vector<8x32xf32>
    %158 = arith.addf %156, %157 : vector<8x32xf32>
    %159 = math.tanh %158 : vector<8x32xf32>
    %160 = arith.mulf %155, %159 : vector<8x32xf32>
    %c56 = arith.constant 56 : index
    %c0_35 = arith.constant 0 : index
    %161 = vector.load %arg11[%c56, %c0_35] : memref<64x32xf32, #tpu.memory_space<vmem>>, vector<8x32xf32>
    tpu.vector_store %arg11[%c56, %c0_35], %160 {strides = array<i32>} : memref<64x32xf32, #tpu.memory_space<vmem>>, vector<8x32xf32>,
    %c0_36 = arith.constant 0 : index
    %c0_37 = arith.constant 0 : index
    %162 = vector.load %arg9[%c0_36, %c0_37] : memref<8x32xf32, #tpu.memory_space<vmem>>, vector<8x32xf32>
    tpu.vector_store %arg9[%c0_36, %c0_37], %160 {strides = array<i32>} : memref<8x32xf32, #tpu.memory_space<vmem>>, vector<8x32xf32>,
    %c0_38 = arith.constant 0 : index
    %c0_39 = arith.constant 0 : index
    %163 = vector.load %arg10[%c0_38, %c0_39] : memref<8x32xf32, #tpu.memory_space<vmem>>, vector<8x32xf32>
    tpu.vector_store %arg10[%c0_38, %c0_39], %158 {strides = array<i32>} : memref<8x32xf32, #tpu.memory_space<vmem>>, vector<8x32xf32>,
    %c0_40 = arith.constant 0 : index
    %c0_41 = arith.constant 0 : index
    %164 = vector.load %arg11[%c0_40, %c0_41] : memref<64x32xf32, #tpu.memory_space<vmem>>, vector<64x32xf32>
    %165 = arith.truncf %164 : vector<64x32xf32> to vector<64x32xbf16>
    %c0_42 = arith.constant 0 : index
    %c0_43 = arith.constant 0 : index
    %166 = vector.load %arg6[%c0_42, %c0_43] : memref<32x16xbf16, #tpu.memory_space<vmem>>, vector<32x16xbf16>
    %cst_44 = arith.constant dense<0.000000e+00> : vector<64x16xf32>
    %167 = tpu.matmul %165, %166, %cst_44 {dimension_numbers = #tpu.dot_dimension_numbers<[1], [0], [0], [1], [0, 0, 1, 1], [], []>} : vector<64x32xbf16>, vector<32x16xbf16>, vector<64x16xf32> -> vector<64x16xf32>
    %c0_45 = arith.constant 0 : index
    %c0_46 = arith.constant 0 : index
    %168 = vector.load %arg7[%c0_45, %c0_46] : memref<1x16xf32, #tpu.memory_space<vmem>>, vector<1x16xf32>
    %169 = vector.broadcast %168 : vector<1x16xf32> to vector<64x16xf32>
    %170 = arith.addf %167, %169 : vector<64x16xf32>
    %c0_47 = arith.constant 0 : index
    %c0_48 = arith.constant 0 : index
    %171 = vector.load %arg8[%c0_47, %c0_48] : memref<64x16xf32, #tpu.memory_space<vmem>>, vector<64x16xf32>
    tpu.vector_store %arg8[%c0_47, %c0_48], %170 {strides = array<i32>} : memref<64x16xf32, #tpu.memory_space<vmem>>, vector<64x16xf32>,
    return
  }
}

</mosaic_0001>

<bundles_post_ra>
// kernel: tpu_custom_call.1
= control target key start
LH: loop header
LB: loop body
LE: loop exit
PB: predicated region body
PF: predicated region fallthrough
CT: control target
= control target key end

     0   :  { %16 = vsyncpa [#allocation4], 0  ;;  %vm62_vm0 = vcmask 130048   ;;  %v1489_v13 = vmov 0.0|0.0   ;;  %s1804_s0 = inlined_call_operand.vmem [shape: f32[64,16], index: 0, kind: input, shape index: {}]   ;;  %s1805_s1 = inlined_call_operand.vmem [shape: f32[8,32], index: 1, kind: input, shape index: {}]   ;;  %s1806_s2 = inlined_call_operand.vmem [shape: f32[8,32], index: 2, kind: input, shape index: {}]   ;;  %s1807_s3 = inlined_call_operand.vmem [shape: bf16[16,128], index: 3, kind: input, shape index: {}]   ;;  %s1808_s4 = inlined_call_operand.vmem [shape: f32[32,128], index: 4, kind: input, shape index: {}]   ;;  %s1809_s5 = inlined_call_operand.vmem [shape: f32[1,128], index: 5, kind: input, shape index: {}]   ;;  %s1810_s6 = inlined_call_operand.vmem [shape: bf16[32,16], index: 6, kind: input, shape index: {}]   ;;  %s1811_s7 = inlined_call_operand.vmem [shape: f32[1,16], index: 7, kind: input, shape index: {}]   ;;  %s1812_s8 = inlined_call_operand.vmem [shape: f32[64,16], index: 8, kind: output, shape index: {0}]   ;;  %s1813_s9 = inlined_call_operand.hbm [shape: f32[8,32], index: 9, kind: output, shape index: {1}]   ;;  %s1814_s10 = inlined_call_operand.hbm [shape: f32[8,32], index: 10, kind: output, shape index: {2}]  }
   0x1   :  { %v1374_v0 = vld [vmem:[%s1807_s3] sm:$0xff]   ;;  %v40_v2 = vld [vmem:[%s1804_s0 + $0x28] sm:$0xff]  ;;  %v41_v3 = vld [vmem:[%s1804_s0 + $0x30] sm:$0xff] }
   0x2   :  { %v39_v1 = vld [vmem:[%s1804_s0 + $0x20] sm:$0xff]  ;;  %1364 = vmatprep.subr.bf16.mxu1 %v1374_v0  ;;  %1206 = vmatprep.subr.bf16.mxu0 %v1374_v0  ;;  %v42_v5 = vld [vmem:[%s1804_s0 + $0x38] sm:$0xff]  ;;  %v141_v7 = vld [vmem:[%s1808_s4 + $0x8] sm:$0xff] }
   0x3   :  { %v45_v4 = vpack.c.bf16 %v40_v2, %v39_v1  ;;  %v140_v6 = vld [vmem:[%s1808_s4] sm:$0xff]  ;;  %1365 = vmatpush3.bf16.msra.mxu1 %v1374_v0  ;;  %1207 = vmatpush3.bf16.msra.mxu0 %v1374_v0  ;;  %v46_v8 = vpack.c.bf16 %v42_v5, %v41_v3  ;;  %v36_v11 = vld [vmem:[%s1804_s0 + $0x8] sm:$0xff]  ;;  %v37_v12 = vld [vmem:[%s1804_s0 + $0x10] sm:$0xff] }
   0x4   :  { %v1573_v9 = vpack.c.bf16 %v141_v7, %v140_v6  ;;  %v35_v10 = vld [vmem:[%s1804_s0] sm:$0xff]  ;;  %1316 = vmatprep.subr.bf16.mxu1 %v1489_v13  ;;  %v38_v15 = vld [vmem:[%s1804_s0 + $0x18] sm:$0xff]  ;;  %v142_v16 = vld [vmem:[%s1808_s4 + $0x10] sm:$0xff]  ;;  %1328 = vmatprep.subr.bf16.mxu0 %v1489_v13 }
   0x5   :  { %1212 = vmatprep.mubr.msk.bf16.mxu1 %vm62_vm0, %v45_v4  ;;  %v43_v14 = vpack.c.bf16 %v36_v11, %v35_v10  ;;  %v143_v17 = vld [vmem:[%s1808_s4 + $0x18] sm:$0xff]  ;;  %v44_v18 = vpack.c.bf16 %v38_v15, %v37_v12 }
   0x6   :  { %1213 = vmatmul.mubr.msk.bf16.vlgmr.msra.gmra.mrb[0].mxu1 %vm62_vm0, %v46_v8  ;;  %v1600_v19 = vpack.c.bf16 %v143_v17, %v142_v16 }
   0x7   :  { %1208 = vmatprep.mubr.msk.bf16.mxu0 %vm62_vm0, %v43_v14  ;;  %1318 = vmatpush3.bf16.msra.mxu1 %v1573_v9 }
   0x8   :  { %1209 = vmatmul.mubr.msk.bf16.vlgmr.msra.gmra.mrb[0].mxu0 %vm62_vm0, %v44_v18 }
   0x9   :  { %17 = vsyncpa [#allocation6], 0  ;;  %1319 = vmatprep.subr.bf16.mxu1 %v1489_v13  ;;  %vm1490_vm1 = vmmov 0   ;;  %v1491_v20 = vmov 0.0   ;;  %1330 = vmatpush3.bf16.msra.mxu0 %v1573_v9  ;;  %v144_v21 = vld [vmem:[%s1805_s1] sm:$0xff]  ;;  %vm146_vm2 = vcmask 261120  }
   0xa   :  { %1224 = vmatprep.mubr.msk.f32.mxu1 %vm1490_vm1, %v1491_v20  ;;  %1246 = vmatprep.mubr.msk.f32.mxu0 %vm1490_vm1, %v1491_v20  ;;  %v1126_v22 = vld [vmem:[%s1809_s5] ss:$0 sm:$0xff]  ;;  %s1492_s5 = smov 64   ;;  %s1493_s21 = smov 32  }
   0xb   :  { %1331 = vmatprep.subr.bf16.mxu0 %v1489_v13  ;;  %1321 = vmatpush3.bf16.msra.mxu1 %v1600_v19  ;;  %v145_v43 = vld [vmem:[%s1806_s2] sm:$0xff]  ;;  %s1494_s12 = smov 96   ;;  %s1495_s13 = smov [#allocation3]  }
   0xc   :  { %1322 = vmatprep.subr.bf16.mxu1 %v1489_v13  ;;  %s1102_s14 = sshll.u32 %s1495_s13, 4  ;;  %s1496_s15 = smov [#allocation5]   ;;  %s1103_s14 = int_to_ptr.vmem [resolvable:$true] %s1102_s14 }
   0xd   :  { %1333 = vmatpush3.bf16.msra.mxu0 %v1600_v19  ;;  %s1112_s16 = sshll.u32 %s1496_s15, 4  ;;  %s1441_s17 = scalar_lea.vmem %s1103_s14, 128  ;;  %s1113_s16 = int_to_ptr.vmem [resolvable:$true] %s1112_s16 }
   0xe   :  { %1225 = vmatmul.mubr.msk.f32.vlgmr.msra.gmra.mrb[4].mxu1 %vm146_vm2, %v144_v21  ;;  %1340 = vmatprep.subr.bf16.mxu0 %v1489_v13  ;;  %p1442_p0 = scmp.ne.s32.totalorder %s1103_s14, %s1441_s17  ;;  %p1446_p1 = scmp.lt.s32.totalorder %s1103_s14, %s1103_s14 }
   0xf   :  { %1324 = vmatpush3.bf16.msra.mxu1 %v1573_v9  ;;  %1235 = vmatprep.mubr.msk.f32.mxu1 %vm1490_vm1, %v1491_v20  ;;  %p1447_p2 = scmp.lt.s32.totalorder %s1441_s17, %s1441_s17 }
  0x10   :  { %1325 = vmatprep.subr.bf16.mxu1 %v1489_v13 }
  0x11   :  { %p1448_p3 = por %p1447_p2, %p1446_p1 }
  0x13   :  { %1327 = vmatpush3.bf16.msra.mxu1 %v1600_v19  ;;  %p1449_p4 = pnand %p1448_p3, %p1442_p0 }
  0x14   :  { %1334 = vmatprep.subr.bf16.mxu1 %v1489_v13 }
  0xd9   :  { %v1214_v23 = vpop.f32.mrb[0].mxu1 }
  0xda   :  { %v1626_v24 = vadd.f32 %v1214_v23, %v1126_v22  ;;  %v125_v25 = vpop.f32.mrb[1].mxu1 }
  0xdb   :  { %v1210_v26 = vpop.f32.mrb[0].mxu0  ;;  %v1628_v27 = vadd.f32 %v1126_v22, %v125_v25  ;;  %v1215_v28 = vpop.f32.mrb[2].mxu1 }
  0xdc   :  { %v1630_v29 = vadd.f32 %v1210_v26, %v1126_v22  ;;  %v109_v30 = vpop.f32.mrb[1].mxu0  ;;  %v1632_v31 = vadd.f32 %v1215_v28, %v1126_v22  ;;  %v128_v32 = vpop.f32.mrb[3].mxu1 }
  0xdd   :  { %v1211_v33 = vpop.f32.mrb[2].mxu0  ;;  %v1634_v34 = vadd.f32 %v1126_v22, %v128_v32  ;;  %v110_v37 = vadd.f32 %v1126_v22, %v109_v30 }
  0xde   :  { %v1636_v35 = vadd.f32 %v1211_v33, %v1126_v22  ;;  %v112_v36 = vpop.f32.mrb[3].mxu0 }
  0xdf   :  { %v113_v38 = vadd.f32 %v1126_v22, %v112_v36 }
  0xe1   :  { %v216_v39 = vpop.f32.mrb[4].mxu1 }
  0xe2   :  { %v220_v40 = vadd.f32 %v216_v39, %v110_v37  ;;  %v1226_v41 = vpop.f32.mrb[5].mxu1 }
  0xe4   :  { %1377 = vtanh.f32 %v220_v40  ;;  %v1133_v44 = vmul.f32 -1.442695, %v220_v40 }
  0xe6   :  { %1379 = vpow2.f32 %v1133_v44 }
  0xee   :  { %v1378_v42 = vpop.eup %1377 }
  0xef   :  { %234 = vrot.lane.b32.xlu0 %v1378_v42, %s1492_s5 }
  0xf0   :  { %v1380_v45 = vpop.eup %1379 }
  0xf1   :  { %v224_v46 = vadd.f32 1.0, %v1380_v45 }
  0xf3   :  { %229 = vrot.lane.b32.xlu0 %v145_v43, %s1493_s21  ;;  %1381 = vrcp.f32 %v224_v46 }
  0xfd   :  { %v1382_v47 = vpop.eup %1381 }
 0x161   :  { %v235_v48 = vpop.permute.xlu0 %234 }
 0x162   :  { %v237_v49 = vmul.f32 %v1382_v47, %v235_v48 }
 0x164   :  { %239 = vrot.lane.b32.xlu1 %v237_v49, %s1493_s21 }
 0x165   :  { %v230_v50 = vpop.permute.xlu0 %229 }
 0x166   :  { %v232_v51 = vmul.f32 %v1382_v47, %v230_v50 }
 0x1d6   :  { %v240_v52 = vpop.permute.xlu1 %239 }
 0x1d7   :  { %v242_v53 = vadd.f32 %v240_v52, %v232_v51 }
 0x1d9   :  { %1383 = vtanh.f32 %v242_v53 }
 0x1e3   :  { %v1384_v54 = vpop.eup %1383 }
 0x1e4   :  { %245 = vrot.lane.b32.xlu1 %v1384_v54, %s1492_s5 }
 0x256   :  { %v246_v55 = vpop.permute.xlu1 %245 }
 0x257   :  { %v248_v56 = vmul.f32 %v1382_v47, %v246_v55 }
 0x259   :  { %250 = vrot.lane.b32.xlu0 %v248_v56, %s1493_s21 }
 0x2cb   :  { %v251_v57 = vpop.permute.xlu0 %250 }
 0x2cc   :  { %253 = vst.msk [vmem:[#allocation2] sm:$0xff] %vm146_vm2, %v251_v57  ;;  %1236 = vmatmul.mubr.msk.f32.vlgmr.msra.gmra.mrb[6].mxu1 %vm146_vm2, %v251_v57 }
 0x2cd   :  { %1336 = vmatpush3.bf16.msra.mxu1 %v1573_v9  ;;  %1257 = vmatprep.mubr.msk.f32.mxu1 %vm1490_vm1, %v1491_v20 }
 0x2ce   :  { %1337 = vmatprep.subr.bf16.mxu1 %v1489_v13 }
 0x2d1   :  { %1339 = vmatpush3.bf16.msra.mxu1 %v1600_v19 }
 0x2d2   :  { %1346 = vmatprep.subr.bf16.mxu1 %v1489_v13 }
 0x39f   :  { %v322_v58 = vpop.f32.mrb[6].mxu1 }
 0x3a0   :  { %v326_v59 = vadd.f32 %v322_v58, %v113_v38  ;;  %v1237_v60 = vpop.f32.mrb[7].mxu1 }
 0x3a2   :  { %1385 = vtanh.f32 %v326_v59  ;;  %v1135_v62 = vmul.f32 -1.442695, %v326_v59 }
 0x3a4   :  { %1387 = vpow2.f32 %v1135_v62 }
 0x3ac   :  { %v1386_v61 = vpop.eup %1385 }
 0x3ad   :  { %336 = vrot.lane.b32.xlu1 %v1386_v61, %s1492_s5 }
 0x3ae   :  { %v1388_v63 = vpop.eup %1387 }
 0x3af   :  { %v330_v0 = vadd.f32 1.0, %v1388_v63 }
 0x3b1   :  { %1389 = vrcp.f32 %v330_v0 }
 0x3bb   :  { %v1390_v1 = vpop.eup %1389 }
 0x3bc   :  { %v334_v4 = vmul.f32 %v1390_v1, %v242_v53 }
 0x41f   :  { %v337_v2 = vpop.permute.xlu1 %336 }
 0x420   :  { %v339_v3 = vmul.f32 %v1390_v1, %v337_v2 }
 0x422   :  { %341 = vrot.lane.b32.xlu0 %v339_v3, %s1493_s21 }
 0x494   :  { %v342_v5 = vpop.permute.xlu0 %341 }
 0x495   :  { %v344_v6 = vadd.f32 %v342_v5, %v334_v4 }
 0x497   :  { %1391 = vtanh.f32 %v344_v6 }
 0x4a1   :  { %v1392_v7 = vpop.eup %1391 }
 0x4a2   :  { %347 = vrot.lane.b32.xlu1 %v1392_v7, %s1492_s5 }
 0x514   :  { %v348_v8 = vpop.permute.xlu1 %347 }
 0x515   :  { %v350_v10 = vmul.f32 %v1390_v1, %v348_v8 }
 0x517   :  { %352 = vrot.lane.b32.xlu0 %v350_v10, %s1493_s21 }
 0x589   :  { %v353_v11 = vpop.permute.xlu0 %352 }
 0x58a   :  { %355 = vst.msk [vmem:[#allocation2 + $0x8] sm:$0xff] %vm146_vm2, %v353_v11  ;;  %1247 = vmatmul.mubr.msk.f32.vlgmr.msra.gmra.mrb[4].mxu0 %vm146_vm2, %v353_v11 }
 0x58b   :  { %1342 = vmatpush3.bf16.msra.mxu0 %v1573_v9  ;;  %1268 = vmatprep.mubr.msk.f32.mxu0 %vm1490_vm1, %v1491_v20 }
 0x58c   :  { %1343 = vmatprep.subr.bf16.mxu0 %v1489_v13 }
 0x58f   :  { %1345 = vmatpush3.bf16.msra.mxu0 %v1600_v19 }
 0x590   :  { %1352 = vmatprep.subr.bf16.mxu0 %v1489_v13 }
 0x65d   :  { %v424_v12 = vpop.f32.mrb[4].mxu0 }
 0x65e   :  { %v428_v14 = vadd.f32 %v424_v12, %v1630_v29  ;;  %v1248_v15 = vpop.f32.mrb[5].mxu0 }
 0x660   :  { %1393 = vtanh.f32 %v428_v14  ;;  %v1137_v17 = vmul.f32 -1.442695, %v428_v14 }
 0x662   :  { %1395 = vpow2.f32 %v1137_v17 }
 0x66a   :  { %v1394_v16 = vpop.eup %1393 }
 0x66b   :  { %438 = vrot.lane.b32.xlu1 %v1394_v16, %s1492_s5 }
 0x66c   :  { %v1396_v18 = vpop.eup %1395 }
 0x66d   :  { %v432_v21 = vadd.f32 1.0, %v1396_v18 }
 0x66f   :  { %1397 = vrcp.f32 %v432_v21  ;;  %v975_v21 = vld [vmem:[#allocation2 + $0x8] sm:$0xff] }
 0x679   :  { %v1398_v22 = vpop.eup %1397 }
 0x67a   :  { %v436_v26 = vmul.f32 %v1398_v22, %v344_v6 }
 0x6dd   :  { %v439_v23 = vpop.permute.xlu1 %438 }
 0x6de   :  { %v441_v25 = vmul.f32 %v1398_v22, %v439_v23  ;;  %v1376_v23 = vld [vmem:[%s1810_s6 + $0x8] sm:$0xff]  }
 0x6e0   :  { %443 = vrot.lane.b32.xlu0 %v441_v25, %s1493_s21 }
 0x752   :  { %v444_v28 = vpop.permute.xlu0 %443 }
 0x753   :  { %v446_v30 = vadd.f32 %v444_v28, %v436_v26 }
 0x755   :  { %1399 = vtanh.f32 %v446_v30 }
 0x75f   :  { %v1400_v29 = vpop.eup %1399 }
 0x760   :  { %449 = vrot.lane.b32.xlu1 %v1400_v29, %s1492_s5 }
 0x7d2   :  { %v450_v32 = vpop.permute.xlu1 %449 }
 0x7d3   :  { %v452_v33 = vmul.f32 %v1398_v22, %v450_v32  ;;  %v974_v22 = vld [vmem:[#allocation2] sm:$0xff] }
 0x7d4   :  { %v982_v26 = vpack.c.bf16 %v975_v21, %v974_v22 }
 0x7d5   :  { %454 = vrot.lane.b32.xlu0 %v452_v33, %s1493_s21 }
 0x847   :  { %v455_v36 = vpop.permute.xlu0 %454 }
 0x848   :  { %457 = vst.msk [vmem:[#allocation2 + $0x10] sm:$0xff] %vm146_vm2, %v455_v36  ;;  %1258 = vmatmul.mubr.msk.f32.vlgmr.msra.gmra.mrb[8].mxu1 %vm146_vm2, %v455_v36 }
 0x849   :  { %1348 = vmatpush3.bf16.msra.mxu1 %v1573_v9  ;;  %1279 = vmatprep.mubr.msk.f32.mxu1 %vm1490_vm1, %v1491_v20 }
 0x84a   :  { %1349 = vmatprep.subr.bf16.mxu1 %v1489_v13 }
 0x84d   :  { %1351 = vmatpush3.bf16.msra.mxu1 %v1600_v19 }
 0x84e   :  { %1358 = vmatprep.subr.bf16.mxu1 %v1489_v13 }
 0x91b   :  { %v526_v37 = vpop.f32.mrb[8].mxu1 }
 0x91c   :  { %v530_v38 = vadd.f32 %v526_v37, %v1636_v35  ;;  %v1259_v39 = vpop.f32.mrb[9].mxu1 }
 0x91e   :  { %1401 = vtanh.f32 %v530_v38  ;;  %v1139_v41 = vmul.f32 -1.442695, %v530_v38 }
 0x920   :  { %1403 = vpow2.f32 %v1139_v41 }
 0x928   :  { %v1402_v40 = vpop.eup %1401 }
 0x929   :  { %540 = vrot.lane.b32.xlu1 %v1402_v40, %s1492_s5  ;;  %v1723_v40 = vld [vmem:[%s1811_s7] ss:$0 sm:$0xff] }
 0x92a   :  { %v1404_v42 = vpop.eup %1403 }
 0x92b   :  { %v534_v43 = vadd.f32 1.0, %v1404_v42 }
 0x92d   :  { %1405 = vrcp.f32 %v534_v43 }
 0x937   :  { %v1406_v44 = vpop.eup %1405 }
 0x938   :  { %v538_v47 = vmul.f32 %v1406_v44, %v446_v30  ;;  %v976_v30 = vld [vmem:[#allocation2 + $0x10] sm:$0xff] }
 0x99b   :  { %v541_v45 = vpop.permute.xlu1 %540 }
 0x99c   :  { %v543_v46 = vmul.f32 %v1406_v44, %v541_v45 }
 0x99e   :  { %545 = vrot.lane.b32.xlu0 %v543_v46, %s1493_s21 }
 0xa10   :  { %v546_v48 = vpop.permute.xlu0 %545 }
 0xa11   :  { %v548_v49 = vadd.f32 %v546_v48, %v538_v47 }
 0xa13   :  { %1407 = vtanh.f32 %v548_v49 }
 0xa1d   :  { %v1408_v35 = vpop.eup %1407 }
 0xa1e   :  { %551 = vrot.lane.b32.xlu1 %v1408_v35, %s1492_s5 }
 0xa90   :  { %v552_v50 = vpop.permute.xlu1 %551 }
 0xa91   :  { %v554_v51 = vmul.f32 %v1406_v44, %v552_v50 }
 0xa93   :  { %556 = vrot.lane.b32.xlu0 %v554_v51, %s1493_s21 }
 0xb05   :  { %v557_v52 = vpop.permute.xlu0 %556 }
 0xb06   :  { %559 = vst.msk [vmem:[#allocation2 + $0x18] sm:$0xff] %vm146_vm2, %v557_v52  ;;  %1269 = vmatmul.mubr.msk.f32.vlgmr.msra.gmra.mrb[6].mxu0 %vm146_vm2, %v557_v52 }
 0xb07   :  { %1354 = vmatpush3.bf16.msra.mxu0 %v1573_v9  ;;  %1290 = vmatprep.mubr.msk.f32.mxu0 %vm1490_vm1, %v1491_v20 }
 0xb08   :  { %1355 = vmatprep.subr.bf16.mxu0 %v1489_v13 }
 0xb0b   :  { %1357 = vmatpush3.bf16.msra.mxu0 %v1600_v19 }
 0xb0d   :  { %v977_v28 = vld [vmem:[#allocation2 + $0x18] sm:$0xff] }
 0xb0e   :  { %v983_v29 = vpack.c.bf16 %v977_v28, %v976_v30 }
 0xbd9   :  { %v628_v53 = vpop.f32.mrb[6].mxu0 }
 0xbda   :  { %v632_v54 = vadd.f32 %v628_v53, %v1628_v27  ;;  %v1270_v55 = vpop.f32.mrb[7].mxu0 }
 0xbdc   :  { %1409 = vtanh.f32 %v632_v54  ;;  %v1141_v57 = vmul.f32 -1.442695, %v632_v54 }
 0xbde   :  { %1411 = vpow2.f32 %v1141_v57 }
 0xbe6   :  { %v1410_v56 = vpop.eup %1409 }
 0xbe7   :  { %642 = vrot.lane.b32.xlu1 %v1410_v56, %s1492_s5 }
 0xbe8   :  { %v1412_v58 = vpop.eup %1411 }
 0xbe9   :  { %v636_v59 = vadd.f32 1.0, %v1412_v58 }
 0xbeb   :  { %1413 = vrcp.f32 %v636_v59 }
 0xbf5   :  { %v1414_v60 = vpop.eup %1413 }
 0xbf6   :  { %v640_v63 = vmul.f32 %v1414_v60, %v548_v49 }
 0xc59   :  { %v643_v61 = vpop.permute.xlu1 %642 }
 0xc5a   :  { %v645_v62 = vmul.f32 %v1414_v60, %v643_v61 }
 0xc5c   :  { %647 = vrot.lane.b32.xlu0 %v645_v62, %s1493_s21 }
 0xcce   :  { %v648_v0 = vpop.permute.xlu0 %647 }
 0xccf   :  { %v650_v1 = vadd.f32 %v648_v0, %v640_v63 }
 0xcd1   :  { %1415 = vtanh.f32 %v650_v1 }
 0xcdb   :  { %v1416_v27 = vpop.eup %1415 }
 0xcdc   :  { %653 = vrot.lane.b32.xlu1 %v1416_v27, %s1492_s5 }
 0xd4e   :  { %v654_v2 = vpop.permute.xlu1 %653 }
 0xd4f   :  { %v656_v3 = vmul.f32 %v1414_v60, %v654_v2 }
 0xd51   :  { %658 = vrot.lane.b32.xlu0 %v656_v3, %s1493_s21 }
 0xdc3   :  { %v659_v4 = vpop.permute.xlu0 %658 }
 0xdc4   :  { %661 = vst.msk [vmem:[#allocation2 + $0x20] sm:$0xff] %vm146_vm2, %v659_v4  ;;  %1280 = vmatmul.mubr.msk.f32.vlgmr.msra.gmra.mrb[10].mxu1 %vm146_vm2, %v659_v4 }
 0xdc5   :  { %1360 = vmatpush3.bf16.msra.mxu1 %v1573_v9  ;;  %1301 = vmatprep.mubr.msk.f32.mxu1 %vm1490_vm1, %v1491_v20 }
 0xdc6   :  { %1361 = vmatprep.subr.bf16.mxu1 %v1489_v13 }
 0xdc9   :  { %1363 = vmatpush3.bf16.msra.mxu1 %v1600_v19 }
 0xdcb   :  { %v978_v32 = vld [vmem:[#allocation2 + $0x20] sm:$0xff] }
 0xe97   :  { %v730_v5 = vpop.f32.mrb[10].mxu1 }
 0xe98   :  { %v734_v6 = vadd.f32 %v730_v5, %v1634_v34  ;;  %v1281_v7 = vpop.f32.mrb[11].mxu1  ;;  %v1375_v34 = vld [vmem:[%s1810_s6] sm:$0xff]  }
 0xe99   :  { %1304 = vmatprep.subr.bf16.mxu0 %v1375_v34 }
 0xe9a   :  { %1417 = vtanh.f32 %v734_v6  ;;  %v1143_v10 = vmul.f32 -1.442695, %v734_v6 }
 0xe9c   :  { %1419 = vpow2.f32 %v1143_v10 }
 0xea4   :  { %v1418_v8 = vpop.eup %1417 }
 0xea5   :  { %744 = vrot.lane.b32.xlu1 %v1418_v8, %s1492_s5 }
 0xea6   :  { %v1420_v11 = vpop.eup %1419 }
 0xea7   :  { %v738_v12 = vadd.f32 1.0, %v1420_v11 }
 0xea9   :  { %1421 = vrcp.f32 %v738_v12 }
 0xeb3   :  { %v1422_v9 = vpop.eup %1421 }
 0xeb4   :  { %v742_v13 = vmul.f32 %v1422_v9, %v650_v1 }
 0xf17   :  { %v745_v14 = vpop.permute.xlu1 %744 }
 0xf18   :  { %v747_v20 = vmul.f32 %v1422_v9, %v745_v14 }
 0xf1a   :  { %749 = vrot.lane.b32.xlu0 %v747_v20, %s1493_s21 }
 0xf8c   :  { %v750_v19 = vpop.permute.xlu0 %749 }
 0xf8d   :  { %v752_v15 = vadd.f32 %v750_v19, %v742_v13 }
 0xf8f   :  { %1423 = vtanh.f32 %v752_v15 }
 0xf99   :  { %v1424_v16 = vpop.eup %1423 }
 0xf9a   :  { %755 = vrot.lane.b32.xlu1 %v1424_v16, %s1492_s5 }
0x100c   :  { %v756_v17 = vpop.permute.xlu1 %755 }
0x100d   :  { %v758_v18 = vmul.f32 %v1422_v9, %v756_v17 }
0x100f   :  { %760 = vrot.lane.b32.xlu0 %v758_v18, %s1493_s21 }
0x1081   :  { %v761_v25 = vpop.permute.xlu0 %760 }
0x1082   :  { %763 = vst.msk [vmem:[#allocation2 + $0x28] sm:$0xff] %vm146_vm2, %v761_v25  ;;  %1291 = vmatmul.mubr.msk.f32.vlgmr.msra.gmra.mrb[8].mxu0 %vm146_vm2, %v761_v25 }
0x1083   :  { %1305 = vmatpush3.bf16.msra.mxu0 %v1375_v34  ;;  %1308 = vmatprep.mubr.msk.bf16.mxu0 %vm146_vm2, %v982_v26 }
0x1084   :  { %1306 = vmatprep.subr.bf16.mxu0 %v1376_v23 }
0x1087   :  { %1307 = vmatpush3.bf16.msra.mxu0 %v1376_v23 }
0x1089   :  { %v979_v33 = vld [vmem:[#allocation2 + $0x28] sm:$0xff] }
0x108a   :  { %1309 = vmatmul.mubr.msk.bf16.vlgmr.msra.gmra.mrb[12].mxu0 %vm146_vm2, %v983_v29  ;;  %v984_v36 = vpack.c.bf16 %v979_v33, %v978_v32 }
0x108c   :  { %1312 = vmatprep.mubr.msk.bf16.mxu0 %vm146_vm2, %v984_v36 }
0x1155   :  { %v832_v37 = vpop.f32.mrb[8].mxu0 }
0x1156   :  { %v836_v38 = vadd.f32 %v832_v37, %v1626_v24  ;;  %v1292_v39 = vpop.f32.mrb[9].mxu0 }
0x1158   :  { %1425 = vtanh.f32 %v836_v38  ;;  %v1145_v49 = vmul.f32 -1.442695, %v836_v38 }
0x115a   :  { %1427 = vpow2.f32 %v1145_v49 }
0x115d   :  { %v1310_v41 = vpop.f32.mrb[12].mxu0 }
0x115e   :  { %v1064_v42 = vadd.f32 %v1310_v41, %v1723_v40  ;;  %v1055_v43 = vpop.f32.mrb[13].mxu0 }
0x115f   :  { %v1056_v44 = vadd.f32 %v1723_v40, %v1055_v43  ;;  %v1311_v45 = vpop.f32.mrb[14].mxu0 }
0x1160   :  { %1088 = vst.msk [vmem:[%s1812_s8 + $0x10] sm:$0xff] %vm62_vm0, %v1064_v42  ;;  %v1067_v24 = vadd.f32 %v1311_v45, %v1723_v40  ;;  %v1058_v46 = vpop.f32.mrb[15].mxu0 }
0x1161   :  { %1086 = vst.msk [vmem:[%s1812_s8] sm:$0xff] %vm62_vm0, %v1056_v44  ;;  %v1059_v47 = vadd.f32 %v1723_v40, %v1058_v46 }
0x1162   :  { %v1426_v48 = vpop.eup %1425  ;;  %1089 = vst.msk [vmem:[%s1812_s8 + $0x18] sm:$0xff] %vm62_vm0, %v1067_v24 }
0x1163   :  { %1087 = vst.msk [vmem:[%s1812_s8 + $0x8] sm:$0xff] %vm62_vm0, %v1059_v47  ;;  %846 = vrot.lane.b32.xlu1 %v1426_v48, %s1492_s5 }
0x1164   :  { %v1428_v35 = vpop.eup %1427 }
0x1165   :  { %v840_v50 = vadd.f32 1.0, %v1428_v35 }
0x1167   :  { %1429 = vrcp.f32 %v840_v50 }
0x1171   :  { %v1430_v51 = vpop.eup %1429 }
0x1172   :  { %v844_v54 = vmul.f32 %v1430_v51, %v752_v15 }
0x11d5   :  { %v847_v52 = vpop.permute.xlu1 %846 }
0x11d6   :  { %v849_v53 = vmul.f32 %v1430_v51, %v847_v52 }
0x11d8   :  { %851 = vrot.lane.b32.xlu0 %v849_v53, %s1493_s21 }
0x124a   :  { %v852_v55 = vpop.permute.xlu0 %851 }
0x124b   :  { %v854_v56 = vadd.f32 %v852_v55, %v844_v54 }
0x124d   :  { %1431 = vtanh.f32 %v854_v56 }
0x1257   :  { %v1432_v57 = vpop.eup %1431 }
0x1258   :  { %857 = vrot.lane.b32.xlu1 %v1432_v57, %s1492_s5 }
0x12ca   :  { %v858_v58 = vpop.permute.xlu1 %857 }
0x12cb   :  { %v860_v59 = vmul.f32 %v1430_v51, %v858_v58 }
0x12cd   :  { %862 = vrot.lane.b32.xlu0 %v860_v59, %s1493_s21 }
0x133f   :  { %v863_v60 = vpop.permute.xlu0 %862 }
0x1340   :  { %865 = vst.msk [vmem:[#allocation2 + $0x30] sm:$0xff] %vm146_vm2, %v863_v60  ;;  %1302 = vmatmul.mubr.msk.f32.vlgmr.msra.gmra.mrb[12].mxu1 %vm146_vm2, %v863_v60 }
0x1347   :  { %v980_v14 = vld [vmem:[#allocation2 + $0x30] sm:$0xff] }
0x1413   :  { %v934_v61 = vpop.f32.mrb[12].mxu1 }
0x1414   :  { %v938_v62 = vadd.f32 %v934_v61, %v1632_v31  ;;  %v1303_v63 = vpop.f32.mrb[13].mxu1 }
0x1416   :  { %1433 = vtanh.f32 %v938_v62  ;;  %v1147_v1 = vmul.f32 -1.442695, %v938_v62 }
0x1418   :  { %1435 = vpow2.f32 %v1147_v1 }
0x1420   :  { %v1434_v0 = vpop.eup %1433 }
0x1421   :  { %948 = vrot.lane.b32.xlu1 %v1434_v0, %s1492_s5 }
0x1422   :  { %v1436_v27 = vpop.eup %1435 }
0x1423   :  { %v942_v2 = vadd.f32 1.0, %v1436_v27 }
0x1425   :  { %1437 = vrcp.f32 %v942_v2 }
0x142f   :  { %v1438_v3 = vpop.eup %1437 }
0x1430   :  { %v946_v6 = vmul.f32 %v1438_v3, %v854_v56 }
0x1493   :  { %v949_v4 = vpop.permute.xlu1 %948 }
0x1494   :  { %v951_v5 = vmul.f32 %v1438_v3, %v949_v4 }
0x1496   :  { %953 = vrot.lane.b32.xlu0 %v951_v5, %s1493_s21 }
0x1508   :  { %v954_v7 = vpop.permute.xlu0 %953 }
0x1509   :  { %v956_v8 = vadd.f32 %v954_v7, %v946_v6 }
0x150b   :  { %1439 = vtanh.f32 %v956_v8 }
0x1515   :  { %v1440_v31 = vpop.eup %1439 }
0x1516   :  { %959 = vrot.lane.b32.xlu1 %v1440_v31, %s1492_s5 }
0x151a   :  { %970 = vrot.lane.b32.xlu1 %v956_v8, %s1494_s12 }
0x1588   :  { %v960_v10 = vpop.permute.xlu1 %959 }
0x1589   :  { %v962_v11 = vmul.f32 %v1438_v3, %v960_v10 }
0x158b   :  { %964 = vrot.lane.b32.xlu0 %v962_v11, %s1493_s21 }
0x158c   :  { %v971_v12 = vpop.permute.xlu1 %970 }
0x158d   :  { %973 = vst.msk [vmem:[#allocation5] sm:$0xff] %vm146_vm2, %v971_v12 }
0x15fd   :  { %v965_v9 = vpop.permute.xlu0 %964 }
0x15fe   :  { %967 = vst.msk [vmem:[#allocation2 + $0x38] sm:$0xff] %vm146_vm2, %v965_v9  ;;  %968 = vst.msk [vmem:[#allocation3] sm:$0xff] %vm146_vm2, %v965_v9 }
0x1605   :  { %v981_v20 = vld [vmem:[#allocation2 + $0x38] sm:$0xff] }
0x1606   :  { %v985_v13 = vpack.c.bf16 %v981_v20, %v980_v14 }
0x1608   :  { %1313 = vmatmul.mubr.msk.bf16.gmra.mrb[16].mxu0 %vm146_vm2, %v985_v13 }
0x1609   :  { %1452 = shalt.err (!%p1449_p4)
}
0x160a   :  { %s1453_s1 = scalar_lea.hbm %s1813_s9, 128 }
0x160b   :  { %p1454_p5 = scmp.ne.s32.totalorder %s1813_s9, %s1453_s1  ;;  %p1457_p6 = scmp.lt.u32.totalorder %s1453_s1, %s1813_s9 }
0x160d   :  { %p1459_p7 = pnand %p1457_p6, %p1454_p5 }
0x160f   :  { %1462 = shalt.err (!%p1459_p7)
}
0x1610   :  { %1105 = dma.vmem_to_hbm [thread:$0]  %s1103_s14, 128, %s1813_s9, [#allocation4]  }
0x1611   :  { %s1463_s22 = scalar_lea.vmem %s1113_s16, 128  ;;  %p1468_p9 = scmp.lt.s32.totalorder %s1113_s16, %s1113_s16 }
0x1612   :  { %p1464_p8 = scmp.ne.s32.totalorder %s1113_s16, %s1463_s22  ;;  %p1469_p10 = scmp.lt.s32.totalorder %s1463_s22, %s1463_s22 }
0x1614   :  { %p1470_p11 = por %p1469_p10, %p1468_p9 }
0x1616   :  { %p1471_p12 = pnand %p1470_p11, %p1464_p8 }
0x1618   :  { %1474 = shalt.err (!%p1471_p12)
}
0x1619   :  { %s1475_s6 = scalar_lea.hbm %s1814_s10, 128 }
0x161a   :  { %p1476_p13 = scmp.ne.s32.totalorder %s1814_s10, %s1475_s6  ;;  %p1479_p0 = scmp.lt.u32.totalorder %s1475_s6, %s1814_s10 }
0x161c   :  { %p1481_p1 = pnand %p1479_p0, %p1476_p13 }
0x161e   :  { %1484 = shalt.err (!%p1481_p1)
}
0x161f   :  { %1115 = dma.vmem_to_hbm [thread:$0]  %s1113_s16, 128, %s1814_s10, [#allocation6]  }
0x16db   :  { %v1314_v19 = vpop.f32.mrb[16].mxu0 }
0x16dc   :  { %v1080_v15 = vadd.f32 %v1314_v19, %v1723_v40  ;;  %v1071_v34 = vpop.f32.mrb[17].mxu0 }
0x16dd   :  { %v1072_v16 = vadd.f32 %v1723_v40, %v1071_v34  ;;  %v1315_v17 = vpop.f32.mrb[18].mxu0 }
0x16de   :  { %1092 = vst.msk [vmem:[%s1812_s8 + $0x30] sm:$0xff] %vm62_vm0, %v1080_v15  ;;  %v1083_v18 = vadd.f32 %v1315_v17, %v1723_v40  ;;  %v1074_v21 = vpop.f32.mrb[19].mxu0 }
0x16df   :  { %1090 = vst.msk [vmem:[%s1812_s8 + $0x20] sm:$0xff] %vm62_vm0, %v1072_v16  ;;  %v1075_v22 = vadd.f32 %v1723_v40, %v1074_v21 }
0x16e0   :  { %1093 = vst.msk [vmem:[%s1812_s8 + $0x38] sm:$0xff] %vm62_vm0, %v1083_v18 }
0x16e1   :  { %1091 = vst.msk [vmem:[%s1812_s8 + $0x28] sm:$0xff] %vm62_vm0, %v1075_v22 }
0x16e2   :  { %1485 = dma.done.wait [#allocation4], 128  }
0x16e3   :  { %1486 = vsyncadd [#allocation4], 4294967168 }
0x16e4   :  { %1487 = dma.done.wait [#allocation6], 128  }
0x16e5   :  { %1488 = vsyncadd [#allocation6], 4294967168 }
0x16e6   :  { %1124 = vsyncpa [#allocation4], 1 }
0x16e7   :  { %1125 = vsyncpa [#allocation6], 1 }

</bundles_post_ra>
